<compile_context>
chip_gen: v6e
topology: v6e:2x2x1
jax: 0.10.0
libtpu: 0.0.40
codegen_flags: <defaults>
</compile_context>

<pallas_src>
import functools

import jax
import jax.numpy as jnp
from jax.experimental import pallas as pl
from jax.experimental.pallas import tpu as pltpu


def _round_up(n, m):
    return ((n + m - 1) // m) * m


_H2_PAD = 128   # fc2 output lanes padded 64 -> 128 with zeros (weights resident, free)


def _mlp_kernel(x_ref, w1_ref, b1_ref, w2_ref, b2_ref, w3_ref, b3_ref, o_ref):
    # fc1 + relu: x cast to bf16 in-kernel (no extra HBM pass), f32 accumulation.
    x = x_ref[...].astype(jnp.bfloat16)
    h1 = jnp.dot(x, w1_ref[...], preferred_element_type=jnp.float32)
    h1 = jnp.maximum(h1 + b1_ref[...], 0.0)
    # fc2 + relu (output lanes zero-padded to 128; padded lanes stay exactly 0).
    h2 = jnp.dot(h1.astype(jnp.bfloat16), w2_ref[...],
                 preferred_element_type=jnp.float32)
    h2 = jnp.maximum(h2 + b2_ref[...], 0.0)
    # fc3 in f32 for output precision (costs nothing: kernel is mem-bound).
    out = jnp.dot(h2, w3_ref[...], preferred_element_type=jnp.float32)
    o_ref[...] = (out + b3_ref[...]).astype(o_ref.dtype)


def prepare_params(w1, b1, w2, b2, w3, b3):
    """One-time parameter packing (hoisted out of the per-call forward path).

    Takes PyTorch nn.Linear layout (W: [out, in], b: [out]) and returns
    kernel-ready params: W transposed to [in, out]; fc1/fc2 weights in bf16;
    fc2 cols / fc3 rows zero-padded so hidden-2 is 128 lanes; fc3 + all biases
    kept in f32; biases reshaped to [1, out].
    """
    H1 = w1.shape[0]            # 128
    H2 = w2.shape[0]            # 64
    out_dim = w3.shape[0]
    pad2 = _H2_PAD - H2

    w1_k = jnp.asarray(w1, jnp.float32).T.astype(jnp.bfloat16)              # [F, 128]
    b1_k = jnp.asarray(b1, jnp.float32).reshape(1, H1)                      # [1, 128]
    w2_k = jnp.pad(jnp.asarray(w2, jnp.float32).T,
                   ((0, 0), (0, pad2))).astype(jnp.bfloat16)                # [128, 128]
    b2_k = jnp.pad(jnp.asarray(b2, jnp.float32).reshape(1, H2),
                   ((0, 0), (0, pad2)))                                     # [1, 128]
    w3_k = jnp.pad(jnp.asarray(w3, jnp.float32).T, ((0, pad2), (0, 0)))     # [128, out] f32
    b3_k = jnp.asarray(b3, jnp.float32).reshape(1, out_dim)                 # [1, out]
    return (w1_k, b1_k, w2_k, b2_k, w3_k, b3_k)


def _choose_tb(batch, tb):
    if tb is None:
        if batch <= 16:
            return batch
        # >= 2 grid steps so "parallel" can shard across v7x's two TensorCores;
        # tiles up to 2048 rows amortize the ~0.35us per-step overhead.
        tb = min(2048, _round_up(pl.cdiv(batch, 2), 8))
    tb = _round_up(max(int(tb), 8), 8)      # sublane-align user-supplied tb
    tb = min(tb, 4096)
    if tb >= batch:
        return batch
    return tb


def _vmem_limit_bytes(tb, F, H1, H2p, out_dim):
    lane = lambda n: _round_up(n, 128)
    sub = lambda n: _round_up(n, 8)
    x_blk = sub(tb) * lane(F) * 4                     # f32 x block
    o_blk = sub(tb) * lane(out_dim) * 4               # f32 out block
    w_res = (sub(F) * lane(H1) * 2 + sub(H1) * lane(H2p) * 2
             + sub(H2p) * lane(out_dim) * 4
             + 8 * (lane(H1) + lane(H2p) + lane(out_dim)) * 4)
    interm = sub(tb) * (lane(H1) * 4 + lane(H1) * 2 + lane(H2p) * 4
                        + lane(out_dim) * 4)          # h1 f32/bf16, h2, out
    # x/out double-buffered, weights counted twice to be safe, + headroom.
    return 2 * (x_blk + o_blk + w_res) + interm + (2 << 20)


@functools.partial(jax.jit, static_argnames=("tb",))
def stock_predictor_forward(x, params, *, tb=None):
    """Pallas forward pass of StockPredictor.

    x:      [B, input_dim] float32
    params: output of prepare_params()
    returns [B, out_dim]   float32
    """
    w1, b1, w2, b2, w3, b3 = params
    B, F = x.shape
    H1 = w1.shape[1]            # 128
    H2p = w2.shape[1]           # 128 (padded)
    out_dim = w3.shape[1]

    tb = _choose_tb(B, tb)
    grid = (pl.cdiv(B, tb),)

    # Weights/biases: whole array as the block, constant block index -> stay
    # resident in VMEM across all batch tiles (no re-DMA per grid step).
    resident = lambda a: pl.BlockSpec(a.shape, lambda i: (0,) * a.ndim)

    flops = 2 * B * (F * H1 + H1 * H2p + H2p * out_dim)
    bytes_accessed = (
        x.size * 4
        + (w1.size + w2.size) * 2
        + (w3.size + b1.size + b2.size + b3.size) * 4
        + B * out_dim * 4
    )

    return pl.pallas_call(
        _mlp_kernel,
        out_shape=jax.ShapeDtypeStruct((B, out_dim), jnp.float32),
        grid=grid,
        in_specs=[
            pl.BlockSpec((tb, F), lambda i: (i, 0)),   # batch-tiled activations
            resident(w1), resident(b1),
            resident(w2), resident(b2),
            resident(w3), resident(b3),
        ],
        # Unpadded output block (last dim == full array last dim): writes only
        # the useful bytes; no post-kernel slice pass needed.
        out_specs=pl.BlockSpec((tb, out_dim), lambda i: (i, 0)),
        compiler_params=pltpu.CompilerParams(
            dimension_semantics=("parallel",),
            vmem_limit_bytes=_vmem_limit_bytes(tb, F, H1, H2p, out_dim),
        ),
        cost_estimate=pl.CostEstimate(
            flops=flops, transcendentals=0, bytes_accessed=bytes_accessed),
    )(x, w1, b1, w2, b2, w3, b3)


def _init_linear(key, fan_in, fan_out):
    """PyTorch nn.Linear default init; returns PyTorch layout W [out, in], b [out]."""
    kw, kb = jax.random.split(key)
    bound = 1.0 / jnp.sqrt(jnp.float32(fan_in))
    w = jax.random.uniform(kw, (fan_out, fan_in), jnp.float32, -bound, bound)
    b = jax.random.uniform(kb, (fan_out,), jnp.float32, -bound, bound)
    return w, b


def _reference_forward(x, w1, b1, w2, b2, w3, b3):
    h1 = jnp.maximum(x @ w1.T + b1, 0.0)
    h2 = jnp.maximum(h1 @ w2.T + b2, 0.0)
    return h2 @ w3.T + b3


if __name__ == "__main__":
    key = jax.random.PRNGKey(0)
    k_x, k1, k2, k3 = jax.random.split(key, 4)

    # Small shapes consistent with the module:
    #   input_dim  = X_train.shape[1]  -> 32
    #   output_dim = returns.shape[1]  -> 16
    batch, input_dim, out_dim = 64, 32, 16

    x = jax.random.normal(k_x, (batch, input_dim), jnp.float32)
    w1, b1 = _init_linear(k1, input_dim, 128)
    w2, b2 = _init_linear(k2, 128, 64)
    w3, b3 = _init_linear(k3, 64, out_dim)

    params = prepare_params(w1, b1, w2, b2, w3, b3)   # one-time packing

    y = stock_predictor_forward(x, params)            # default tb -> grid=(2,)
    y = jax.block_until_ready(y)

    y_ref = _reference_forward(x, w1, b1, w2, b2, w3, b3)
    assert y.shape == (batch, out_dim), y.shape
    # bf16 fc1/fc2 MXU operands (f32 accumulation) + f32 fc3 -> loose tolerance.
    assert jnp.allclose(y, y_ref, atol=2e-2, rtol=2e-2), "mismatch vs reference"

    print("KERNEL_OK")
</pallas_src>

<mosaic_0001>
module attributes {stable_mosaic.version = 11 : i64} {
  func.func @_mlp_kernel(%arg0: i32, %arg1: memref<32x32xf32, #tpu.memory_space<vmem>>, %arg2: memref<32x128xbf16, #tpu.memory_space<vmem>>, %arg3: memref<1x128xf32, #tpu.memory_space<vmem>>, %arg4: memref<128x128xbf16, #tpu.memory_space<vmem>>, %arg5: memref<1x128xf32, #tpu.memory_space<vmem>>, %arg6: memref<128x16xf32, #tpu.memory_space<vmem>>, %arg7: memref<1x16xf32, #tpu.memory_space<vmem>>, %arg8: memref<32x16xf32, #tpu.memory_space<vmem>>) attributes {dimension_semantics = [#tpu.dimension_semantics<parallel>], iteration_bounds = array<i64: 2>, scalar_prefetch = 0 : i64, scratch_operands = 0 : i64, tpu.core_type = #tpu.core_type<tc>, window_params = [{transform_indices = @transform_0, window_bounds = array<i64: 32, 32>}, {pipeline_mode = #tpu.pipeline_mode<synchronous>, transform_indices = @transform_1, window_bounds = array<i64: 32, 128>}, {pipeline_mode = #tpu.pipeline_mode<synchronous>, transform_indices = @transform_2, window_bounds = array<i64: 1, 128>}, {pipeline_mode = #tpu.pipeline_mode<synchronous>, transform_indices = @transform_3, window_bounds = array<i64: 128, 128>}, {pipeline_mode = #tpu.pipeline_mode<synchronous>, transform_indices = @transform_4, window_bounds = array<i64: 1, 128>}, {pipeline_mode = #tpu.pipeline_mode<synchronous>, transform_indices = @transform_5, window_bounds = array<i64: 128, 16>}, {pipeline_mode = #tpu.pipeline_mode<synchronous>, transform_indices = @transform_6, window_bounds = array<i64: 1, 16>}, {transform_indices = @transform_7, window_bounds = array<i64: 32, 16>}]} {
    %c0 = arith.constant 0 : index
    %c0_0 = arith.constant 0 : index
    %0 = vector.load %arg1[%c0, %c0_0] : memref<32x32xf32, #tpu.memory_space<vmem>>, vector<32x32xf32>
    %1 = arith.truncf %0 : vector<32x32xf32> to vector<32x32xbf16>
    %c0_1 = arith.constant 0 : index
    %c0_2 = arith.constant 0 : index
    %2 = vector.load %arg2[%c0_1, %c0_2] : memref<32x128xbf16, #tpu.memory_space<vmem>>, vector<32x128xbf16>
    %cst = arith.constant dense<0.000000e+00> : vector<32x128xf32>
    %3 = tpu.matmul %1, %2, %cst {dimension_numbers = #tpu.dot_dimension_numbers<[1], [0], [0], [1], [0, 0, 1, 1], [], []>} : vector<32x32xbf16>, vector<32x128xbf16>, vector<32x128xf32> -> vector<32x128xf32>
    %c0_3 = arith.constant 0 : index
    %c0_4 = arith.constant 0 : index
    %4 = vector.load %arg3[%c0_3, %c0_4] : memref<1x128xf32, #tpu.memory_space<vmem>>, vector<1x128xf32>
    %5 = vector.broadcast %4 : vector<1x128xf32> to vector<32x128xf32>
    %6 = arith.addf %3, %5 : vector<32x128xf32>
    %cst_5 = arith.constant 0.000000e+00 : f32
    %7 = vector.broadcast %cst_5 : f32 to vector<32x128xf32>
    %8 = arith.maximumf %6, %7 : vector<32x128xf32>
    %9 = arith.truncf %8 : vector<32x128xf32> to vector<32x128xbf16>
    %c0_6 = arith.constant 0 : index
    %c0_7 = arith.constant 0 : index
    %10 = vector.load %arg4[%c0_6, %c0_7] : memref<128x128xbf16, #tpu.memory_space<vmem>>, vector<128x128xbf16>
    %cst_8 = arith.constant dense<0.000000e+00> : vector<32x128xf32>
    %11 = tpu.matmul %9, %10, %cst_8 {dimension_numbers = #tpu.dot_dimension_numbers<[1], [0], [0], [1], [0, 0, 1, 1], [], []>} : vector<32x128xbf16>, vector<128x128xbf16>, vector<32x128xf32> -> vector<32x128xf32>
    %c0_9 = arith.constant 0 : index
    %c0_10 = arith.constant 0 : index
    %12 = vector.load %arg5[%c0_9, %c0_10] : memref<1x128xf32, #tpu.memory_space<vmem>>, vector<1x128xf32>
    %13 = vector.broadcast %12 : vector<1x128xf32> to vector<32x128xf32>
    %14 = arith.addf %11, %13 : vector<32x128xf32>
    %cst_11 = arith.constant 0.000000e+00 : f32
    %15 = vector.broadcast %cst_11 : f32 to vector<32x128xf32>
    %16 = arith.maximumf %14, %15 : vector<32x128xf32>
    %c0_12 = arith.constant 0 : index
    %c0_13 = arith.constant 0 : index
    %17 = vector.load %arg6[%c0_12, %c0_13] : memref<128x16xf32, #tpu.memory_space<vmem>>, vector<128x16xf32>
    %cst_14 = arith.constant dense<0.000000e+00> : vector<32x16xf32>
    %18 = tpu.matmul %16, %17, %cst_14 {dimension_numbers = #tpu.dot_dimension_numbers<[1], [0], [0], [1], [0, 0, 1, 1], [], []>} : vector<32x128xf32>, vector<128x16xf32>, vector<32x16xf32> -> vector<32x16xf32>
    %c0_15 = arith.constant 0 : index
    %c0_16 = arith.constant 0 : index
    %19 = vector.load %arg7[%c0_15, %c0_16] : memref<1x16xf32, #tpu.memory_space<vmem>>, vector<1x16xf32>
    %20 = vector.broadcast %19 : vector<1x16xf32> to vector<32x16xf32>
    %21 = arith.addf %18, %20 : vector<32x16xf32>
    %c0_17 = arith.constant 0 : index
    %c0_18 = arith.constant 0 : index
    %22 = vector.load %arg8[%c0_17, %c0_18] : memref<32x16xf32, #tpu.memory_space<vmem>>, vector<32x16xf32>
    tpu.vector_store %arg8[%c0_17, %c0_18], %21 {strides = array<i32>} : memref<32x16xf32, #tpu.memory_space<vmem>>, vector<32x16xf32>,
    return
  }
  func.func @transform_0(%arg0: i32) -> (i32, i32) {
    %c0_i32 = arith.constant 0 : i32
    %c0_i32_0 = arith.constant 0 : i32
    return %arg0, %c0_i32 : i32, i32
  }
  func.func @transform_1(%arg0: i32) -> (i32, i32) {
    %c0_i32 = arith.constant 0 : i32
    %c0_i32_0 = arith.constant 0 : i32
    %c0_i32_1 = arith.constant 0 : i32
    return %c0_i32, %c0_i32_0 : i32, i32
  }
  func.func @transform_2(%arg0: i32) -> (i32, i32) {
    %c0_i32 = arith.constant 0 : i32
    %c0_i32_0 = arith.constant 0 : i32
    %c0_i32_1 = arith.constant 0 : i32
    return %c0_i32, %c0_i32_0 : i32, i32
  }
  func.func @transform_3(%arg0: i32) -> (i32, i32) {
    %c0_i32 = arith.constant 0 : i32
    %c0_i32_0 = arith.constant 0 : i32
    %c0_i32_1 = arith.constant 0 : i32
    return %c0_i32, %c0_i32_0 : i32, i32
  }
  func.func @transform_4(%arg0: i32) -> (i32, i32) {
    %c0_i32 = arith.constant 0 : i32
    %c0_i32_0 = arith.constant 0 : i32
    %c0_i32_1 = arith.constant 0 : i32
    return %c0_i32, %c0_i32_0 : i32, i32
  }
  func.func @transform_5(%arg0: i32) -> (i32, i32) {
    %c0_i32 = arith.constant 0 : i32
    %c0_i32_0 = arith.constant 0 : i32
    %c0_i32_1 = arith.constant 0 : i32
    return %c0_i32, %c0_i32_0 : i32, i32
  }
  func.func @transform_6(%arg0: i32) -> (i32, i32) {
    %c0_i32 = arith.constant 0 : i32
    %c0_i32_0 = arith.constant 0 : i32
    %c0_i32_1 = arith.constant 0 : i32
    return %c0_i32, %c0_i32_0 : i32, i32
  }
  func.func @transform_7(%arg0: i32) -> (i32, i32) {
    %c0_i32 = arith.constant 0 : i32
    %c0_i32_0 = arith.constant 0 : i32
    return %arg0, %c0_i32 : i32, i32
  }
}

</mosaic_0001>

<bundles_post_ra>
// kernel: stock_predictor_forward.1
= control target key start
LH: loop header
LB: loop body
LE: loop exit
PB: predicated region body
PF: predicated region fallthrough
CT: control target
= control target key end

     0   :  { %s859_s24 = smov 0   ;;  %s970_s0 = inlined_call_operand.vmem [shape: f32[64,32], index: 0, kind: input, shape index: {}]   ;;  %s971_s1 = inlined_call_operand.vmem [shape: bf16[32,128], index: 1, kind: input, shape index: {}]   ;;  %s972_s2 = inlined_call_operand.vmem [shape: f32[1,128], index: 2, kind: input, shape index: {}]   ;;  %s973_s3 = inlined_call_operand.vmem [shape: bf16[128,128], index: 3, kind: input, shape index: {}]   ;;  %s974_s4 = inlined_call_operand.vmem [shape: f32[1,128], index: 4, kind: input, shape index: {}]   ;;  %s975_s5 = inlined_call_operand.vmem [shape: f32[128,16], index: 5, kind: input, shape index: {}]   ;;  %s976_s6 = inlined_call_operand.vmem [shape: f32[1,16], index: 6, kind: input, shape index: {}]   ;;  %s977_s7 = inlined_call_operand.vmem [shape: f32[64,16], index: 7, kind: output, shape index: {}]  }
   0x1 LB: > { %s667_s25 = sadd.s32 4294967295, %s817_s24   ;;  %p671_p0 = scmp.ge.s32.totalorder %s817_s24, 1  ;;  %s817_s24 = sphi %s859_s24, %s17_s24  }
   0x2   : > { %p238_p1 = scmp.lt.s32.totalorder %s817_s24, 3 }
   0x4   : > { %p239_p2 = pnand %p671_p0, %p238_p1 }
   0x5   : > { %s672_s28 = sshll.u32 (!%p239_p2), %s667_s25, 2 }
   0x6   : > { %242 = sbr.rel (%p239_p2) target bundleno = 631 (0x277), region = 48  ;;  %p271_p3 = scmp.lt.s32.totalorder (!%p239_p2), %s672_s28, 7 }
   0xb   : > { %v801_v0 = vld [vmem:[%s971_s1 + $0x8] sm:$0xff]   ;;  %v802_v1 = vld [vmem:[%s971_s1] sm:$0xff]   ;;  %v803_v2 = vld [vmem:[%s973_s3 + $0x38] sm:$0xff]   ;;  %s979_s28 = smov (!%p271_p3, %s672_s28), 7  ;;  %vm312_vm0 = vcmask 261120   ;;  %vm606_vm1 = vcmask 130048  }
   0xc   : > { %727 = vmatprep.subr.bf16.mxu0 %v801_v0  ;;  %v804_v3 = vld [vmem:[%s973_s3 + $0x30] sm:$0xff]   ;;  %735 = vmatprep.subr.bf16.mxu1 %v803_v2  ;;  %s673_s12 = sshll.u32 %s979_s28, 3  ;;  %v805_v4 = vld [vmem:[%s973_s3 + $0x28] sm:$0xff]   ;;  %v806_v11 = vld [vmem:[%s973_s3 + $0x20] sm:$0xff]  }
   0xd   : > { %728 = vmatpush3.bf16.msra.mxu0 %v801_v0  ;;  %736 = vmatpush3.bf16.msra.mxu1 %v803_v2  ;;  %s274_s15 = scalar_lea.vmem %s970_s0, %s673_s12  ;;  %v807_v12 = vld [vmem:[%s973_s3 + $0x18] sm:$0xff]   ;;  %v808_v13 = vld [vmem:[%s973_s3 + $0x10] sm:$0xff]   ;;  %v809_v14 = vld [vmem:[%s973_s3 + $0x8] sm:$0xff]   ;;  %s280_s30 = scalar_lea.vmem %s977_s7, %s673_s12 }
   0xe   : > { %729 = vmatprep.subr.bf16.mxu0 %v802_v1  ;;  %737 = vmatprep.subr.bf16.mxu1 %v804_v3  ;;  %v283_v5 = vld [vmem:[%s274_s15] sm:$0xff]  ;;  %v284_v6 = vld [vmem:[%s274_s15 + $0x8] sm:$0xff]  ;;  %v285_v7 = vld [vmem:[%s274_s15 + $0x10] sm:$0xff] }
   0xf   : > { %v287_v8 = vpack.c.bf16 %v284_v6, %v283_v5  ;;  %v286_v9 = vld [vmem:[%s274_s15 + $0x18] sm:$0xff]  ;;  %v810_v15 = vld [vmem:[%s973_s3] sm:$0xff]   ;;  %v512_v17 = vld [vmem:[%s975_s5 + $0x70] sm:$0xff] }
  0x10   : > { %v288_v10 = vpack.c.bf16 %v286_v9, %v285_v7  ;;  %v513_v16 = vld [vmem:[%s975_s5 + $0x78] sm:$0xff]  ;;  %v511_v18 = vld [vmem:[%s975_s5 + $0x68] sm:$0xff]  ;;  %v510_v19 = vld [vmem:[%s975_s5 + $0x60] sm:$0xff] }
  0x11   : > { %730 = vmatpush3.bf16.msra.mxu0 %v802_v1  ;;  %738 = vmatpush3.bf16.msra.mxu1 %v804_v3  ;;  %v509_v20 = vld [vmem:[%s975_s5 + $0x58] sm:$0xff]  ;;  %v508_v21 = vld [vmem:[%s975_s5 + $0x50] sm:$0xff]  ;;  %v507_v22 = vld [vmem:[%s975_s5 + $0x48] sm:$0xff] }
  0x12   : > { %731 = vmatprep.mubr.msk.bf16.mxu0 %vm312_vm0, %v287_v8  ;;  %739 = vmatprep.subr.bf16.mxu1 %v805_v4  ;;  %v506_v23 = vld [vmem:[%s975_s5 + $0x40] sm:$0xff]  ;;  %v505_v24 = vld [vmem:[%s975_s5 + $0x38] sm:$0xff]  ;;  %v504_v25 = vld [vmem:[%s975_s5 + $0x30] sm:$0xff] }
  0x13   : > { %755 = vmatprep.subr.mxu0 %v513_v16  ;;  %v503_v26 = vld [vmem:[%s975_s5 + $0x28] sm:$0xff]  ;;  %v676_v29 = vld [vmem:[%s972_s2] ss:$0 sm:$0xff]  ;;  %v501_v43 = vld [vmem:[%s975_s5 + $0x18] sm:$0xff] }
  0x14   : > { %732 = vmatmul.mubr.msk.bf16.vlgmr.msra.gmra.mxu0 %vm312_vm0, %v288_v10  ;;  %v502_v42 = vld [vmem:[%s975_s5 + $0x20] sm:$0xff]  ;;  %v500_v44 = vld [vmem:[%s975_s5 + $0x10] sm:$0xff]  ;;  %v499_v45 = vld [vmem:[%s975_s5 + $0x8] sm:$0xff] }
  0x15   : > { %740 = vmatpush3.bf16.msra.mxu1 %v805_v4  ;;  %756 = vmatpush3.msra.mxu0 %v513_v16  ;;  %v498_v46 = vld [vmem:[%s975_s5] sm:$0xff] }
  0x16   : > { %741 = vmatprep.subr.bf16.mxu1 %v806_v11  ;;  %757 = vmatprep.subr.mxu0 %v512_v17  ;;  %v681_v48 = vld [vmem:[%s974_s4] ss:$0 sm:$0xff] }
  0x17   : > { %758 = vmatpush3.msra.mxu0 %v512_v17  ;;  %v690_v61 = vld [vmem:[%s976_s6] ss:$0 sm:$0xff] }
  0x18   : > { %759 = vmatprep.subr.mxu0 %v511_v18 }
  0x19   : > { %742 = vmatpush3.bf16.msra.mxu1 %v806_v11  ;;  %760 = vmatpush3.msra.mxu0 %v511_v18 }
  0x1a   : > { %743 = vmatprep.subr.bf16.mxu1 %v807_v12  ;;  %761 = vmatprep.subr.mxu0 %v510_v19 }
  0x1b   : > { %762 = vmatpush3.msra.mxu0 %v510_v19 }
  0x1c   : > { %763 = vmatprep.subr.mxu0 %v509_v20 }
  0x1d   : > { %744 = vmatpush3.bf16.msra.mxu1 %v807_v12  ;;  %764 = vmatpush3.msra.mxu0 %v509_v20 }
  0x1e   : > { %745 = vmatprep.subr.bf16.mxu1 %v808_v13  ;;  %765 = vmatprep.subr.mxu0 %v508_v21 }
  0x1f   : > { %766 = vmatpush3.msra.mxu0 %v508_v21 }
  0x20   : > { %767 = vmatprep.subr.mxu0 %v507_v22 }
  0x21   : > { %746 = vmatpush3.bf16.msra.mxu1 %v808_v13  ;;  %768 = vmatpush3.msra.mxu0 %v507_v22 }
  0x22   : > { %747 = vmatprep.subr.bf16.mxu1 %v809_v14  ;;  %769 = vmatprep.subr.mxu0 %v506_v23 }
  0x23   : > { %770 = vmatpush3.msra.mxu0 %v506_v23 }
  0x24   : > { %771 = vmatprep.subr.mxu0 %v505_v24 }
  0x25   : > { %748 = vmatpush3.bf16.msra.mxu1 %v809_v14  ;;  %772 = vmatpush3.msra.mxu0 %v505_v24 }
  0x26   : > { %749 = vmatprep.subr.bf16.mxu1 %v810_v15  ;;  %773 = vmatprep.subr.mxu0 %v504_v25 }
  0x27   : > { %774 = vmatpush3.msra.mxu0 %v504_v25 }
  0x28   : > { %775 = vmatprep.subr.mxu0 %v503_v26 }
  0x29   : > { %750 = vmatpush3.bf16.msra.mxu1 %v810_v15  ;;  %776 = vmatpush3.msra.mxu0 %v503_v26 }
  0x2a   : > { %777 = vmatprep.subr.mxu0 %v502_v42 }
  0x2b   : > { %778 = vmatpush3.msra.mxu0 %v502_v42 }
  0x2c   : > { %779 = vmatprep.subr.mxu0 %v501_v43 }
  0x2d   : > { %780 = vmatpush3.msra.mxu0 %v501_v43 }
  0x2e   : > { %781 = vmatprep.subr.mxu0 %v500_v44 }
  0x2f   : > { %782 = vmatpush3.msra.mxu0 %v500_v44 }
  0x30   : > { %783 = vmatprep.subr.mxu0 %v499_v45 }
  0x31   : > { %784 = vmatpush3.msra.mxu0 %v499_v45 }
  0x32   : > { %785 = vmatprep.subr.mxu0 %v498_v46 }
  0x33   : > { %786 = vmatpush3.msra.mxu0 %v498_v46 }
  0xd4   : > { %v733_v27 = vpop.f32.mrf.mxu0 }
  0xd5   : > { %v362_v33 = vadd.f32 %v733_v27, %v676_v29 }
  0xd6   : > { %v353_v28 = vpop.f32.mrf.mxu0 }
  0xd7   : > { %v354_v31 = vadd.f32 %v676_v29, %v353_v28  ;;  %v370_v39 = vmax.f32 %v362_v33, 0.0 }
  0xd8   : > { %v734_v30 = vpop.f32.mrf.mxu0 }
  0xd9   : > { %v365_v32 = vadd.f32 %v734_v30, %v676_v29  ;;  %v368_v37 = vmax.f32 %v354_v31, 0.0 }
  0xda   : > { %v356_v34 = vpop.f32.mrf.mxu0 }
  0xdb   : > { %v357_v35 = vadd.f32 %v676_v29, %v356_v34  ;;  %v371_v36 = vmax.f32 %v365_v32, 0.0 }
  0xdd   : > { %v369_v38 = vmax.f32 %v357_v35, 0.0  ;;  %v373_v41 = vpack.c.bf16 %v371_v36, %v370_v39 }
  0xdf   : > { %v372_v40 = vpack.c.bf16 %v369_v38, %v368_v37 }
  0xe1   : > { %751 = vmatprep.mubr.bf16.mxu1 %v372_v40 }
  0xe2   : > { %752 = vmatmul.mubr.bf16.vlgmr.msra.gmra.mxu1 %v373_v41 }
 0x1a2   : > { %v753_v47 = vpop.f32.mrf.mxu1 }
 0x1a3   : > { %v488_v53 = vadd.f32 %v753_v47, %v681_v48 }
 0x1a4   : > { %v479_v49 = vpop.f32.mrf.mxu1 }
 0x1a5   : > { %v480_v50 = vadd.f32 %v681_v48, %v479_v49  ;;  %v496_v58 = vmax.f32 %v488_v53, 0.0 }
 0x1a6   : > { %v754_v51 = vpop.f32.mrf.mxu1 }
 0x1a7   : > { %v494_v52 = vmax.f32 %v480_v50, 0.0  ;;  %v491_v56 = vadd.f32 %v754_v51, %v681_v48 }
 0x1a8   : > { %v482_v54 = vpop.f32.mrf.mxu1 }
 0x1a9   : > { %v483_v55 = vadd.f32 %v681_v48, %v482_v54  ;;  %787 = vmatprep.mubr.f32.mxu0 %v494_v52  ;;  %v497_v59 = vmax.f32 %v491_v56, 0.0 }
 0x1ab   : > { %v495_v57 = vmax.f32 %v483_v55, 0.0 }
 0x1ad   : > { %788 = vmatmul.mubr.f32.vlgmr.msra.gmra.mxu0 %v495_v57 }
 0x1ae   : > { %790 = vmatprep.mubr.f32.mxu0 %v496_v58 }
 0x1b1   : > { %791 = vmatmul.mubr.f32.gmra.mxu0 %v497_v59 }
 0x26d   : > { %v789_v60 = vpop.f32.mrf.mxu0 }
 0x26e   : > { %v593_v0 = vadd.f32 %v789_v60, %v690_v61 }
 0x26f   : > { %v587_v62 = vpop.f32.mrf.mxu0 }
 0x270   : > { %v588_v63 = vadd.f32 %v690_v61, %v587_v62  ;;  %608 = vst.msk [vmem:[%s280_s30 + $0x8] sm:$0xff] %vm606_vm1, %v593_v0 }
 0x271   : > { %v792_v1 = vpop.f32.mrf.mxu0 }
 0x272   : > { %607 = vst.msk [vmem:[%s280_s30] sm:$0xff] %vm606_vm1, %v588_v63  ;;  %v603_v4 = vadd.f32 %v792_v1, %v690_v61 }
 0x273   : > { %v597_v2 = vpop.f32.mrf.mxu0 }
 0x274   : > { %v598_v3 = vadd.f32 %v690_v61, %v597_v2  ;;  %610 = vst.msk [vmem:[%s280_s30 + $0x18] sm:$0xff] %vm606_vm1, %v603_v4 }
 0x276   : > { %609 = vst.msk [vmem:[%s280_s30 + $0x10] sm:$0xff] %vm606_vm1, %v598_v3 }
 0x277 PF: > { %s17_s24 = sadd.s32 1, %s817_s24  }
 0x278   : > { %p14_p4 = scmp.ge.s32.totalorder %s17_s24, 4  }
 0x27a   :  { %16 = sbr.rel (!%p14_p4) target bundleno = 1 (0x1), region = 78 }

</bundles_post_ra>
